<compile_context>
chip_gen: v7x
topology: tpu7x:2x2x1
jax: 0.10.0
libtpu: 0.0.40
codegen_flags: <defaults>
</compile_context>

<pallas_src>
import functools

import jax
import jax.numpy as jnp
from jax import lax
from jax.experimental import pallas as pl
from jax.experimental.pallas import tpu as pltpu


# ---------------------------------------------------------------------------
# Hardware / sizing helpers
# ---------------------------------------------------------------------------
_DEFAULT_VMEM_BYTES = 64 * 1024 * 1024   # conservative default (v7x per-core)
_SMEM_INDEX_BUDGET = 256 * 1024          # keep prefetched indices well in SMEM


def _vmem_capacity_bytes():
    try:
        info = pltpu.get_tpu_info()
        cap = getattr(info, "vmem_capacity_bytes", 0)
        if cap:
            return int(cap)
    except Exception:
        pass
    return _DEFAULT_VMEM_BYTES


def _lane_pad(n):
    return ((n + 127) // 128) * 128


def _sublane_pad(n):
    return ((n + 7) // 8) * 8


def _vmem_array_bytes(rows, cols, itemsize):
    """Conservative VMEM footprint of a (rows, cols) array (tile padding)."""
    return _sublane_pad(rows) * _lane_pad(cols) * itemsize


def _pick_block_b(B, rows_per_b, cols_padded, itemsize, budget_bytes):
    """Largest batch tile whose rows_per_b*cols rows fit `budget_bytes`,
    rounded to the sublane pack when possible, dividing B exactly, and
    leaving >= 2 tiles when B allows it (v7x megacore occupancy)."""
    row_bytes = max(rows_per_b * cols_padded * itemsize, 1)
    tb = max(1, min(B, budget_bytes // row_bytes))
    pack = 8 if itemsize >= 4 else 16
    if tb >= pack:
        tb -= tb % pack
    if B >= 2 * pack:                       # keep nb >= 2 for megacore
        tb = min(tb, max(pack, B // 2))
    tb = max(1, tb)
    while B % tb != 0:                      # full tiles only
        tb -= 1
    return tb


def _cost_estimate(B, CT, E, itemsize):
    rows = B * (1 + CT)
    return pl.CostEstimate(
        flops=2 * B * CT * E,
        transcendentals=2 * B * CT,
        bytes_accessed=rows * E * itemsize + rows * 4 + B * 4,
    )


# ---------------------------------------------------------------------------
# Shared per-row math
# ---------------------------------------------------------------------------
def _log_sigmoid(x):
    # Stable log(sigmoid(x)) = min(x, 0) - log1p(exp(-|x|)).
    return jnp.minimum(x, 0.0) - jnp.log1p(jnp.exp(-jnp.abs(x)))


def _sign_vector(ct, context_size):
    # +1 for the first `context_size` context columns (positives), -1 after.
    col = lax.broadcasted_iota(jnp.int32, (ct, 1), 0)
    return jnp.where(col < context_size, 1.0, -1.0).astype(jnp.float32)


def _row_loss(ivec, cvec, sign):
    """ivec: (1, E); cvec: (CT, E); sign: (CT, 1).
    Returns sum_j log_sigmoid(sign_j * (cvec_j . ivec)) as an f32 scalar."""
    ivec = ivec.astype(jnp.float32)
    cvec = cvec.astype(jnp.float32)
    # TODO(synk): when E < 128 the lane axis is under-utilized and the axis=-1
    # reduce is cross-lane; a lane-major (C+CN on lanes) restructure would
    # recover VPU throughput, but the op is gather/HBM bound so keep it simple.
    scores = jnp.sum(cvec * ivec, axis=-1, keepdims=True)       # (CT, 1)
    return jnp.sum(_log_sigmoid(scores * sign))


# ---------------------------------------------------------------------------
# Path 1 (primary): tables resident in VMEM, in-kernel gather
# ---------------------------------------------------------------------------
def _sgns_resident_kernel(iword_ref, cwords_ref,        # SMEM scalar prefetch
                          emb_i_ref, emb_o_ref,         # VMEM-resident tables
                          out_ref,                      # (8, 128) per tile
                          cbuf,                         # (CT, E) scratch
                          *, tile_b, context_size, ct):
    TB, C, CT = tile_b, context_size, ct
    b0 = pl.program_id(0) * TB
    sign = _sign_vector(CT, C)                          # hoisted out of loops

    def per_batch_row(b, acc):
        base = (b0 + b) * CT

        def gather_ctx_row(j, carry):
            cidx = cwords_ref[base + j]
            cbuf[pl.ds(j, 1), :] = emb_o_ref[pl.ds(cidx, 1), :]
            return carry

        lax.fori_loop(0, CT, gather_ctx_row, 0)

        ivec = emb_i_ref[pl.ds(iword_ref[b0 + b], 1), :]        # (1, E)
        return acc + _row_loss(ivec, cbuf[...], sign)

    tile_sum = lax.fori_loop(0, TB, per_batch_row, jnp.float32(0.0))
    out_ref[...] = jnp.zeros(out_ref.shape, jnp.float32) + tile_sum * (1.0 / C)


def _sgns_forward_table_resident(emb_i, emb_o, iword, cwords, *, context_size,
                                 block_b, vmem_bytes):
    V_i, E = emb_i.shape
    V_o, E_o = emb_o.shape
    assert E_o == E
    B = iword.shape[0]
    CT = cwords.shape[1]
    itemsize = jnp.dtype(emb_o.dtype).itemsize

    if block_b is None:
        budget = max(vmem_bytes // 8, 2 << 20)
        block_b = _pick_block_b(B, 1 + CT, _lane_pad(E), itemsize, budget)
    TB = block_b
    assert B % TB == 0
    nb = B // TB

    table_vmem = 2 * (_vmem_array_bytes(V_i, E, itemsize)
                      + _vmem_array_bytes(V_o, E, itemsize))
    scratch_vmem = _vmem_array_bytes(CT, E, itemsize)
    vmem_limit = int(min(0.9 * vmem_bytes,
                         max(table_vmem + scratch_vmem + (8 << 20), 32 << 20)))

    kernel = functools.partial(_sgns_resident_kernel, tile_b=TB,
                               context_size=context_size, ct=CT)

    grid_spec = pltpu.PrefetchScalarGridSpec(
        num_scalar_prefetch=2,
        grid=(nb,),
        in_specs=[
            # Full-table blocks with constant index maps: DMA'd once per core
            # by the auto-pipeline and kept resident across all grid steps.
            pl.BlockSpec((V_i, E), lambda i, iw, cw: (0, 0)),
            pl.BlockSpec((V_o, E), lambda i, iw, cw: (0, 0)),
        ],
        out_specs=pl.BlockSpec((None, 8, 128), lambda i, iw, cw: (i, 0, 0)),
        scratch_shapes=[pltpu.VMEM((CT, E), emb_o.dtype)],
    )

    partials = pl.pallas_call(
        kernel,
        grid_spec=grid_spec,
        out_shape=jax.ShapeDtypeStruct((nb, 8, 128), jnp.float32),
        compiler_params=pltpu.CompilerParams(
            dimension_semantics=("parallel",),
            vmem_limit_bytes=vmem_limit),
        cost_estimate=_cost_estimate(B, CT, E, itemsize),
    )(iword.astype(jnp.int32).reshape(-1),
      cwords.astype(jnp.int32).reshape(-1),
      emb_i, emb_o)

    return -(jnp.sum(partials[:, 0, 0]) / B)


# ---------------------------------------------------------------------------
# Path 2 (fallback): XLA gather + batch-tiled, auto-pipelined BlockSpecs
# ---------------------------------------------------------------------------
def _sgns_blockspec_kernel(iv_ref, cv_ref, out_ref, *, context_size):
    TB, CT, _ = cv_ref.shape
    C = context_size
    sign = _sign_vector(CT, C)

    def per_batch_row(b, acc):
        return acc + _row_loss(iv_ref[b], cv_ref[b], sign)

    tile_sum = lax.fori_loop(0, TB, per_batch_row, jnp.float32(0.0))
    out_ref[...] = jnp.zeros(out_ref.shape, jnp.float32) + tile_sum * (1.0 / C)


def _sgns_forward_blockspec(emb_i, emb_o, iword, cwords, *, context_size,
                            block_b, vmem_bytes):
    # TODO(synk): this path round-trips the gathered (B, C+CN, E) tensor
    # through HBM; the table-resident path avoids that whenever the tables
    # fit VMEM and the index arrays fit SMEM.
    ivectors = emb_i[iword][:, None, :]          # (B, 1, E), native dtype
    cvectors = emb_o[cwords]                     # (B, C+CN, E)

    B = ivectors.shape[0]
    E = ivectors.shape[-1]
    CT = cwords.shape[1]
    itemsize = jnp.dtype(emb_o.dtype).itemsize

    if block_b is None:
        budget = max(vmem_bytes // 8, 2 << 20)
        block_b = _pick_block_b(B, 1 + CT, _lane_pad(E), itemsize, budget)
    TB = block_b
    assert B % TB == 0
    nb = B // TB

    tile_bytes = (1 + CT) * TB * _lane_pad(E) * itemsize
    vmem_limit = int(min(0.9 * vmem_bytes,
                         max(2 * tile_bytes + (8 << 20), 32 << 20)))

    kernel = functools.partial(_sgns_blockspec_kernel, context_size=context_size)

    partials = pl.pallas_call(
        kernel,
        grid=(nb,),
        in_specs=[
            pl.BlockSpec((TB, 1, E), lambda i: (i, 0, 0)),
            pl.BlockSpec((TB, CT, E), lambda i: (i, 0, 0)),
        ],
        out_specs=pl.BlockSpec((None, 8, 128), lambda i: (i, 0, 0)),
        out_shape=jax.ShapeDtypeStruct((nb, 8, 128), jnp.float32),
        compiler_params=pltpu.CompilerParams(
            dimension_semantics=("parallel",),
            vmem_limit_bytes=vmem_limit),
        cost_estimate=_cost_estimate(B, CT, E, itemsize),
    )(ivectors, cvectors)

    return -(jnp.sum(partials[:, 0, 0]) / B)


# ---------------------------------------------------------------------------
# Public entry point
# ---------------------------------------------------------------------------
def sgns_forward(emb_i, emb_o, iword, owords, nwords, *, n_negs,
                 block_b=None, table_resident=None):
    """SGNS forward loss. emb_i/emb_o: [V, E]; iword: [B]; owords: [B, C];
    nwords: [B, C*n_negs]. Returns the scalar loss (f32)."""
    V_o, E = emb_o.shape
    assert emb_i.shape[1] == E
    B = iword.shape[0]
    C = owords.shape[1]
    CN = nwords.shape[1]
    assert CN == C * n_negs
    CT = C + CN
    itemsize = jnp.dtype(emb_o.dtype).itemsize

    # Positives and negatives merged into one context-index array.
    cwords = jnp.concatenate(
        [owords.astype(jnp.int32), nwords.astype(jnp.int32)], axis=1)

    vmem_bytes = _vmem_capacity_bytes()

    if table_resident is None:
        table_vmem = 2 * (_vmem_array_bytes(emb_i.shape[0], E, itemsize)
                          + _vmem_array_bytes(V_o, E, itemsize))
        index_smem = 4 * (B + B * CT)
        # TODO(synk): for very large B the index arrays should be tiled into
        # SMEM per batch-tile instead of whole-array scalar prefetch; until
        # then we simply fall back to the XLA-gather path.
        table_resident = (table_vmem + (8 << 20) <= int(0.8 * vmem_bytes)
                          and index_smem <= _SMEM_INDEX_BUDGET)

    if table_resident:
        return _sgns_forward_table_resident(
            emb_i, emb_o, iword, cwords, context_size=C,
            block_b=block_b, vmem_bytes=vmem_bytes)
    return _sgns_forward_blockspec(
        emb_i, emb_o, iword, cwords, context_size=C,
        block_b=block_b, vmem_bytes=vmem_bytes)


# ---------------------------------------------------------------------------
# Pure-JAX reference mirroring the PyTorch forward
# ---------------------------------------------------------------------------
def _reference(emb_i, emb_o, iword, owords, nwords, *, n_negs):
    B = iword.shape[0]
    C = owords.shape[1]
    iv = emb_i[iword].astype(jnp.float32)[:, :, None]        # (B, E, 1)
    ov = emb_o[owords].astype(jnp.float32)                   # (B, C, E)
    nv = -emb_o[nwords].astype(jnp.float32)                  # (B, C*N, E)
    os_ = jnp.squeeze(jnp.matmul(ov, iv), axis=-1)           # (B, C)
    ns_ = jnp.squeeze(jnp.matmul(nv, iv), axis=-1)           # (B, C*N)
    oloss = jnp.mean(jax.nn.log_sigmoid(os_), axis=1)
    nloss = jnp.mean(
        jnp.sum(jax.nn.log_sigmoid(ns_).reshape(B, C, n_negs), axis=2), axis=1)
    return -jnp.mean(oloss + nloss)


if __name__ == "__main__":
    vocab_size = 64
    embed_dim = 32
    batch = 2
    context_size = 8
    n_negs = 20

    key = jax.random.PRNGKey(0)
    k_ei, k_eo, k_iw, k_ow, k_nw = jax.random.split(key, 5)

    # Deterministic "embedding" parameters (forward_i / forward_o tables).
    emb_i = jax.random.normal(k_ei, (vocab_size, embed_dim), jnp.float32) * 0.1
    emb_o = jax.random.normal(k_eo, (vocab_size, embed_dim), jnp.float32) * 0.1

    iword = jax.random.randint(k_iw, (batch,), 0, vocab_size)
    owords = jax.random.randint(k_ow, (batch, context_size), 0, vocab_size)
    # weights=None branch of SGNS: uniform negatives, drawn deterministically
    # outside the kernel so the check is reproducible.
    nwords = jax.random.randint(
        k_nw, (batch, context_size * n_negs), 0, vocab_size)

    ref = _reference(emb_i, emb_o, iword, owords, nwords, n_negs=n_negs)

    # Primary (table-resident, fused gather) path -- auto-selected here.
    loss_resident = jax.block_until_ready(
        sgns_forward(emb_i, emb_o, iword, owords, nwords, n_negs=n_negs,
                     table_resident=None))
    # Fallback (XLA gather + pipelined BlockSpecs) path, forced.
    loss_tiled = jax.block_until_ready(
        sgns_forward(emb_i, emb_o, iword, owords, nwords, n_negs=n_negs,
                     table_resident=False))

    assert jnp.allclose(loss_resident, ref, rtol=1e-5, atol=1e-5), (
        "table-resident path mismatch", loss_resident, ref)
    assert jnp.allclose(loss_tiled, ref, rtol=1e-5, atol=1e-5), (
        "blockspec path mismatch", loss_tiled, ref)

    print("KERNEL_OK")
</pallas_src>

<mosaic_0001>
module attributes {stable_mosaic.version = 11 : i64} {
  func.func @_sgns_resident_kernel(%arg0: i32, %arg1: memref<2xi32, #tpu.memory_space<smem>>, %arg2: memref<336xi32, #tpu.memory_space<smem>>, %arg3: memref<64x32xf32, #tpu.memory_space<vmem>>, %arg4: memref<64x32xf32, #tpu.memory_space<vmem>>, %arg5: memref<1x8x128xf32, #tpu.memory_space<vmem>>, %arg6: memref<168x32xf32, #tpu.memory_space<vmem>>) attributes {dimension_semantics = [#tpu.dimension_semantics<parallel>], iteration_bounds = array<i64: 1>, scalar_prefetch = 2 : i64, scratch_operands = 1 : i64, tpu.core_type = #tpu.core_type<tc>, window_params = [{pipeline_mode = #tpu.pipeline_mode<synchronous>, transform_indices = @transform_0, window_bounds = array<i64: 64, 32>}, {pipeline_mode = #tpu.pipeline_mode<synchronous>, transform_indices = @transform_1, window_bounds = array<i64: 64, 32>}, {transform_indices = @transform_2, window_bounds = array<i64: 1, 8, 128>}]} {
    %c2_i32 = arith.constant 2 : i32
    %0 = arith.muli %arg0, %c2_i32 : i32
    %1 = tpu.iota {dimensions = array<i32: 0>} : vector<168x1xi32>
    %c8_i32 = arith.constant 8 : i32
    %2 = vector.broadcast %c8_i32 : i32 to vector<168x1xi32>
    %3 = arith.cmpi slt, %1, %2 : vector<168x1xi32>
    %cst = arith.constant 1.000000e+00 : f32
    %cst_0 = arith.constant -1.000000e+00 : f32
    %4 = vector.broadcast %cst : f32 to vector<168x1xf32>
    %5 = vector.broadcast %cst_0 : f32 to vector<168x1xf32>
    %6 = arith.select %3, %4, %5 : vector<168x1xi1>, vector<168x1xf32>
    %cst_1 = arith.constant 0.000000e+00 : f32
    %c0_i32 = arith.constant 0 : i32
    %c2_i32_2 = arith.constant 2 : i32
    %7 = arith.addi %c0_i32, %c2_i32_2 : i32
    %c1_i32 = arith.constant 1 : i32
    %8 = scf.for %arg7 = %c0_i32 to %7 step %c1_i32 iter_args(%arg8 = %cst_1) -> (f32)  : i32 {
      %16 = arith.addi %0, %arg7 : i32
      %c168_i32 = arith.constant 168 : i32
      %17 = arith.muli %16, %c168_i32 : i32
      %c0_i32_8 = arith.constant 0 : i32
      %c168_i32_9 = arith.constant 168 : i32
      %18 = arith.addi %c0_i32_8, %c168_i32_9 : i32
      %c1_i32_10 = arith.constant 1 : i32
      scf.for %arg9 = %c0_i32_8 to %18 step %c1_i32_10  : i32 {
        %43 = arith.addi %17, %arg9 : i32
        %44 = arith.index_cast %43 : i32 to index
        %45 = memref.load %arg2[%44] : memref<336xi32, #tpu.memory_space<smem>>
        %46 = arith.index_cast %45 : i32 to index
        %c0_19 = arith.constant 0 : index
        %47 = vector.load %arg4[%46, %c0_19] : memref<64x32xf32, #tpu.memory_space<vmem>>, vector<1x32xf32>
        %48 = arith.index_cast %arg9 : i32 to index
        %c0_20 = arith.constant 0 : index
        %49 = vector.load %arg6[%48, %c0_20] : memref<168x32xf32, #tpu.memory_space<vmem>>, vector<1x32xf32>
        tpu.vector_store %arg6[%48, %c0_20], %47 {strides = array<i32>} : memref<168x32xf32, #tpu.memory_space<vmem>>, vector<1x32xf32>,
      }
      %c168_i32_11 = arith.constant 168 : i32
      %19 = arith.addi %0, %arg7 : i32
      %20 = arith.index_cast %19 : i32 to index
      %21 = memref.load %arg1[%20] : memref<2xi32, #tpu.memory_space<smem>>
      %22 = arith.index_cast %21 : i32 to index
      %c0_12 = arith.constant 0 : index
      %23 = vector.load %arg3[%22, %c0_12] : memref<64x32xf32, #tpu.memory_space<vmem>>, vector<1x32xf32>
      %c0_13 = arith.constant 0 : index
      %c0_14 = arith.constant 0 : index
      %24 = vector.load %arg6[%c0_13, %c0_14] : memref<168x32xf32, #tpu.memory_space<vmem>>, vector<168x32xf32>
      %25 = vector.broadcast %23 : vector<1x32xf32> to vector<168x32xf32>
      %26 = arith.mulf %24, %25 : vector<168x32xf32>
      %cst_15 = arith.constant dense<0.000000e+00> : vector<168xf32>
      %27 = vector.multi_reduction <add>, %26, %cst_15 [1] : vector<168x32xf32> to vector<168xf32>
      %28 = vector.shape_cast %27 : vector<168xf32> to vector<168x1xf32>
      %29 = arith.mulf %28, %6 : vector<168x1xf32>
      %cst_16 = arith.constant 0.000000e+00 : f32
      %30 = vector.broadcast %cst_16 : f32 to vector<168x1xf32>
      %31 = arith.minimumf %29, %30 : vector<168x1xf32>
      %32 = math.absf %29 : vector<168x1xf32>
      %cst_17 = arith.constant 0.000000e+00 : f32
      %33 = vector.broadcast %cst_17 : f32 to vector<168x1xf32>
      %34 = arith.subf %33, %32 : vector<168x1xf32>
      %35 = math.exp %34 : vector<168x1xf32>
      %36 = math.log1p %35 : vector<168x1xf32>
      %37 = arith.subf %31, %36 : vector<168x1xf32>
      %38 = vector.shape_cast %37 : vector<168x1xf32> to vector<1x168x1xf32>
      %cst_18 = arith.constant dense<0.000000e+00> : vector<1xf32>
      %39 = vector.multi_reduction <add>, %38, %cst_18 [1, 2] : vector<1x168x1xf32> to vector<1xf32>
      %40 = vector.shape_cast %39 : vector<1xf32> to vector<1x1x1xf32>
      %41 = vector.extract %40[0, 0, 0] : f32 from vector<1x1x1xf32>
      %42 = arith.addf %arg8, %41 : f32
      scf.yield %42 : f32
    }
    %c2_i32_3 = arith.constant 2 : i32
    %cst_4 = arith.constant 0.000000e+00 : f32
    %9 = vector.broadcast %cst_4 : f32 to vector<8x128xf32>
    %cst_5 = arith.constant 1.250000e-01 : f32
    %10 = arith.mulf %8, %cst_5 : f32
    %11 = vector.broadcast %10 : f32 to vector<8x128xf32>
    %12 = arith.addf %9, %11 : vector<8x128xf32>
    %c0 = arith.constant 0 : index
    %c0_6 = arith.constant 0 : index
    %c0_7 = arith.constant 0 : index
    %13 = vector.load %arg5[%c0, %c0_6, %c0_7] : memref<1x8x128xf32, #tpu.memory_space<vmem>>, vector<1x8x128xf32>
    %14 = vector.shape_cast %13 : vector<1x8x128xf32> to vector<8x128xf32>
    %15 = vector.shape_cast %12 : vector<8x128xf32> to vector<1x8x128xf32>
    tpu.vector_store %arg5[%c0, %c0_6, %c0_7], %15 {strides = array<i32>} : memref<1x8x128xf32, #tpu.memory_space<vmem>>, vector<1x8x128xf32>,
    return
  }
  func.func @transform_0(%arg0: i32, %arg1: memref<2xi32, #tpu.memory_space<smem>>, %arg2: memref<336xi32, #tpu.memory_space<smem>>) -> (i32, i32) {
    %c0_i32 = arith.constant 0 : i32
    %c0_i32_0 = arith.constant 0 : i32
    %c0_i32_1 = arith.constant 0 : i32
    return %c0_i32, %c0_i32_0 : i32, i32
  }
  func.func @transform_1(%arg0: i32, %arg1: memref<2xi32, #tpu.memory_space<smem>>, %arg2: memref<336xi32, #tpu.memory_space<smem>>) -> (i32, i32) {
    %c0_i32 = arith.constant 0 : i32
    %c0_i32_0 = arith.constant 0 : i32
    %c0_i32_1 = arith.constant 0 : i32
    return %c0_i32, %c0_i32_0 : i32, i32
  }
  func.func @transform_2(%arg0: i32, %arg1: memref<2xi32, #tpu.memory_space<smem>>, %arg2: memref<336xi32, #tpu.memory_space<smem>>) -> (i32, i32, i32) {
    %c0_i32 = arith.constant 0 : i32
    %c0_i32_0 = arith.constant 0 : i32
    %c0_i32_1 = arith.constant 0 : i32
    return %arg0, %c0_i32, %c0_i32_0 : i32, i32, i32
  }
}

</mosaic_0001>

<bundles_post_ra>
// kernel: tpu_custom_call.1
= control target key start
LH: loop header
LB: loop body
LE: loop exit
PB: predicated region body
PF: predicated region fallthrough
CT: control target
= control target key end

     0   :  { %s1251_s0 = inlined_call_operand.vmem [shape: s32[2], index: 0, kind: input, shape index: {}]   ;;  %s1252_s2 = inlined_call_operand.vmem [shape: f32[64,32], index: 2, kind: input, shape index: {}]   ;;  %s1253_s3 = inlined_call_operand.vmem [shape: f32[64,32], index: 3, kind: input, shape index: {}]   ;;  %s1254_s4 = inlined_call_operand.hbm [shape: f32[1,8,128], index: 4, kind: output, shape index: {}]   ;;  %s1255_s1 = inlined_call_operand.vmem [shape: s32[336], index: 1, kind: input, shape index: {}]  }
   0x1   :  { %s9_s17 = sshll.u32 %s1251_s0, 4  ;;  %s13_s20 = sshll.u32 %s1255_s1, 4  ;;  %s10_s17 = int_to_ptr.vmem [resolvable:$true] %s9_s17  ;;  %s14_s20 = int_to_ptr.vmem [resolvable:$true] %s13_s20 }
   0x2   :  { %s760_s21 = scalar_lea.vmem %s10_s17, 16  ;;  %p765_p1 = scmp.lt.s32.totalorder %s10_s17, %s10_s17 }
   0x3   :  { %p761_p0 = scmp.ne.s32.totalorder %s10_s17, %s760_s21  ;;  %p766_p2 = scmp.lt.s32.totalorder %s760_s21, %s760_s21 }
   0x5   :  { %p767_p3 = por %p766_p2, %p765_p1 }
   0x7   :  { %p768_p4 = pnand %p767_p3, %p761_p0 }
   0x9   :  { %771 = shalt.err (!%p768_p4)  }
   0xa   :  { %s834_s22 = smov [#allocation4]   ;;  %s772_s23 = scalar_lea.vmem %s14_s20, 48 }
   0xb   :  { %12 = dma.vmem_to_smem %s10_s17, 16, %s834_s22, [#allocation3] }
   0xc   :  { %p773_p5 = scmp.ne.s32.totalorder %s14_s20, %s772_s23  ;;  %s776_s24 = scalar_lea.vmem %s14_s20, 64 }
   0xd   :  { %p777_p6 = scmp.lt.s32.totalorder %s14_s20, %s14_s20  ;;  %p778_p7 = scmp.lt.s32.totalorder %s776_s24, %s772_s23 }
   0xf   :  { %p779_p8 = por %p778_p7, %p777_p6 }
  0x11   :  { %p780_p9 = pnand %p779_p8, %p773_p5 }
  0x13   :  { %783 = shalt.err (!%p780_p9)  }
  0x14   :  { %s835_s0 = smov [#allocation5]  }
  0x15   :  { %16 = dma.vmem_to_smem %s14_s20, 48, %s835_s0, [#allocation3] }
  0x16   :  { %818 = dma.done.wait [#allocation3], 64 }
  0x17   :  { %819 = vsyncadd [#allocation3], 4294967232 }
  0x18   :  { %18 = sfence }
  0x19   :  { %19 = vsyncpa [#allocation7], 0  ;;  %s868_s1 = smov 0.0   ;;  %s870_s25 = smov 0  }
  0x1a LB: > { %s97_s26 = smul.u32 168, %s828_s25  ;;  %s830_s27 = smov 0   ;;  %s828_s25 = sphi %s870_s25, %s94_s25   ;;  %s824_s1 = sphi %s868_s1, %s1284_s1  }
  0x1b LB: >> { %vm109_vm0 = vcmask 253952   ;;  %s108_s7 = scalar_lea.vmem [#allocation2], %s832_s27  ;;  %s832_s27 = sphi %s830_s27, %s103_s27  }
  0x1c   : >> { %s104_s28 = sadd.s32 %s832_s27, %s97_s26  ;;  %s103_s27 = sadd.s32 1, %s832_s27  }
  0x1d   : >> { %s105_s29 = sld [smem:[#allocation5 + %s104_s28]]  ;;  %p100_p10 = scmp.ge.s32.totalorder %s103_s27, 168  }
  0x1e   : > { %s111_s8 = sld [smem:[#allocation4 + %s828_s25]] (%p100_p10)  ;;  %vm160_vm1 = vcmask (%p100_p10), 261120   ;;  %vm560_vm2 = vcmask (%p100_p10), 7168   ;;  %s94_s25 = sadd.s32 (%p100_p10), 1, %s828_s25  }
  0x1f   : > { %102 = sbr.rel (!%p100_p10) target bundleno = 27 (0x1b), region = 45  ;;  %p91_p11 = scmp.ge.s32.totalorder (%p100_p10), %s94_s25, 2  }
  0x23   : >> { %s106_s6 = scalar_lea.vmem %s1253_s3, %s105_s29 }
  0x24   : >> { %v107_v0 = vld [vmem:[%s106_s6] sm:$0x1]  ;;  %s112_s11 = scalar_lea.vmem (%p100_p10), %s1252_s2, %s111_s8 }
  0x25   : >> { %110 = vst.msk [vmem:[%s108_s7] sm:$0x1] %vm109_vm0, %v107_v0  ;;  %v886_v5 = vld [vmem:[%s112_s11] ss:$0 sm:$0xff] (%p100_p10) }
  0x26   :  { %s836_s15 = smov (%p91_p11), [#allocation6]  }
  0x27   :  { %s622_s16 = sshll.u32 (%p91_p11), %s836_s15, 4  ;;  %s623_s16 = int_to_ptr.vmem [resolvable:$true] %s622_s16 }
  0x28   :  { %s784_s17 = scalar_lea.vmem (%p91_p11), %s623_s16, 128  ;;  %p789_p13 = scmp.lt.s32.totalorder (%p91_p11), %s623_s16, %s623_s16 }
  0x29   :  { %p785_p12 = scmp.ne.s32.totalorder (%p91_p11), %s623_s16, %s784_s17  ;;  %p790_p0 = scmp.lt.s32.totalorder (%p91_p11), %s784_s17, %s784_s17 }
  0x2b   :  { %p791_p1 = por (%p91_p11), %p790_p0, %p789_p13 }
  0x2c   : > { %v116_v1 = vld [vmem:[#allocation2 + $0x10] sm:$0xff]  ;;  %v115_v2 = vld [vmem:[#allocation2 + $0x8] sm:$0xff]  ;;  %v117_v3 = vld [vmem:[#allocation2 + $0x18] sm:$0xff] }
  0x2d   : > { %v114_v4 = vld [vmem:[#allocation2] sm:$0xff]  ;;  %v141_v6 = vmul.f32 %v886_v5, %v116_v1  ;;  %v140_v7 = vmul.f32 %v886_v5, %v115_v2  ;;  %v142_v8 = vmul.f32 %v886_v5, %v117_v3  ;;  %v119_v10 = vld [vmem:[#allocation2 + $0x28] sm:$0xff]  ;;  %v121_v18 = vld [vmem:[#allocation2 + $0x38] sm:$0xff]  ;;  %p792_p2 = pnand (%p91_p11), %p791_p1, %p785_p12 }
  0x2e   : > { %v139_v9 = vmul.f32 %v886_v5, %v114_v4  ;;  %v118_v11 = vld [vmem:[#allocation2 + $0x20] sm:$0xff]  ;;  %v144_v16 = vmul.f32 %v886_v5, %v119_v10  ;;  %v120_v19 = vld [vmem:[#allocation2 + $0x30] sm:$0xff]  ;;  %v146_v22 = vmul.f32 %v886_v5, %v121_v18  ;;  %v123_v24 = vld [vmem:[#allocation2 + $0x48] sm:$0xff] }
  0x2f   : > { %v167_v12 = vsel %vm160_vm1, %v141_v6, 0.0  ;;  %v164_v13 = vsel %vm160_vm1, %v140_v7, 0.0  ;;  %v170_v14 = vsel %vm160_vm1, %v142_v8, 0.0  ;;  %v143_v17 = vmul.f32 %v886_v5, %v118_v11  ;;  %v122_v25 = vld [vmem:[#allocation2 + $0x40] sm:$0xff]  ;;  %v125_v30 = vld [vmem:[#allocation2 + $0x58] sm:$0xff]  ;;  %v124_v31 = vld [vmem:[#allocation2 + $0x50] sm:$0xff] }
  0x30   : > { %168 = vadd.xlane.f32.xlu1 %v167_v12  ;;  %165 = vadd.xlane.f32.xlu0 %v164_v13  ;;  %v161_v15 = vsel %vm160_vm1, %v139_v9, 0.0  ;;  %v176_v20 = vsel %vm160_vm1, %v144_v16, 0.0  ;;  %v145_v23 = vmul.f32 %v886_v5, %v120_v19  ;;  %v182_v26 = vsel %vm160_vm1, %v146_v22, 0.0  ;;  %v127_v36 = vld [vmem:[#allocation2 + $0x68] sm:$0xff]  ;;  %v126_v37 = vld [vmem:[#allocation2 + $0x60] sm:$0xff]  ;;  %v129_v42 = vld [vmem:[#allocation2 + $0x78] sm:$0xff] }
  0x31   : > { %v173_v21 = vsel %vm160_vm1, %v143_v17, 0.0  ;;  %v148_v28 = vmul.f32 %v886_v5, %v123_v24  ;;  %v147_v29 = vmul.f32 %v886_v5, %v122_v25  ;;  %v150_v34 = vmul.f32 %v886_v5, %v125_v30  ;;  %v128_v43 = vld [vmem:[#allocation2 + $0x70] sm:$0xff]  ;;  %v131_v48 = vld [vmem:[#allocation2 + $0x88] sm:$0xff]  ;;  %v130_v49 = vld [vmem:[#allocation2 + $0x80] sm:$0xff] }
  0x32   : > { %v179_v27 = vsel %vm160_vm1, %v145_v23, 0.0  ;;  %v149_v35 = vmul.f32 %v886_v5, %v124_v31  ;;  %v152_v40 = vmul.f32 %v886_v5, %v127_v36  ;;  %v151_v41 = vmul.f32 %v886_v5, %v126_v37  ;;  %v133_v54 = vld [vmem:[#allocation2 + $0x98] sm:$0xff]  ;;  %v132_v55 = vld [vmem:[#allocation2 + $0x90] sm:$0xff]  ;;  %v134_v60 = vld [vmem:[#allocation2 + $0xa0] sm:$0xff] }
  0x33   : > { %v188_v32 = vsel %vm160_vm1, %v148_v28, 0.0  ;;  %v185_v33 = vsel %vm160_vm1, %v147_v29, 0.0  ;;  %v194_v38 = vsel %vm160_vm1, %v150_v34, 0.0  ;;  %v154_v46 = vmul.f32 %v886_v5, %v129_v42 }
  0x34   : > { %171 = vadd.xlane.f32.xlu1 %v170_v14  ;;  %162 = vadd.xlane.f32.xlu0 %v161_v15  ;;  %v191_v39 = vsel %vm160_vm1, %v149_v35, 0.0  ;;  %v200_v44 = vsel %vm160_vm1, %v152_v40, 0.0  ;;  %v197_v45 = vsel %vm160_vm1, %v151_v41, 0.0  ;;  %v153_v47 = vmul.f32 %v886_v5, %v128_v43 }
  0x35   : > { %v206_v50 = vsel %vm160_vm1, %v154_v46, 0.0  ;;  %v156_v52 = vmul.f32 %v886_v5, %v131_v48  ;;  %v155_v53 = vmul.f32 %v886_v5, %v130_v49  ;;  %v158_v58 = vmul.f32 %v886_v5, %v133_v54 }
  0x36   : > { %v203_v51 = vsel %vm160_vm1, %v153_v47, 0.0  ;;  %v157_v59 = vmul.f32 %v886_v5, %v132_v55  ;;  %v159_v63 = vmul.f32 %v886_v5, %v134_v60 }
  0x37   : > { %v212_v56 = vsel %vm160_vm1, %v156_v52, 0.0  ;;  %v209_v57 = vsel %vm160_vm1, %v155_v53, 0.0  ;;  %v218_v61 = vsel %vm160_vm1, %v158_v58, 0.0 }
  0x38   : > { %177 = vadd.xlane.f32.xlu1 %v176_v20  ;;  %174 = vadd.xlane.f32.xlu0 %v173_v21  ;;  %v215_v62 = vsel %vm160_vm1, %v157_v59, 0.0  ;;  %v221_v0 = vsel %vm160_vm1, %v159_v63, 0.0 }
  0x3c   : > { %183 = vadd.xlane.f32.xlu1 %v182_v26  ;;  %180 = vadd.xlane.f32.xlu0 %v179_v27 }
  0x40   : > { %189 = vadd.xlane.f32.xlu1 %v188_v32  ;;  %186 = vadd.xlane.f32.xlu0 %v185_v33 }
  0x44   : > { %195 = vadd.xlane.f32.xlu1 %v194_v38  ;;  %192 = vadd.xlane.f32.xlu0 %v191_v39 }
  0x48   : > { %201 = vadd.xlane.f32.xlu1 %v200_v44  ;;  %198 = vadd.xlane.f32.xlu0 %v197_v45 }
  0x4c   : > { %207 = vadd.xlane.f32.xlu1 %v206_v50  ;;  %204 = vadd.xlane.f32.xlu0 %v203_v51 }
  0x50   : > { %213 = vadd.xlane.f32.xlu1 %v212_v56  ;;  %210 = vadd.xlane.f32.xlu0 %v209_v57 }
  0x54   : > { %219 = vadd.xlane.f32.xlu1 %v218_v61  ;;  %216 = vadd.xlane.f32.xlu0 %v215_v62 }
  0x58   : > { %222 = vadd.xlane.f32.xlu0 %v221_v0 }
  0xbd   : > { %v169_v1 = vpop.xlane.xlu1 %168  ;;  %v166_v2 = vpop.xlane.xlu0 %165 }
  0xbe   : > { %v930_v3 = vmul.f32 -1.0, %v169_v1  ;;  %v932_v4 = vmul.f32 -1.0, %v166_v2 }
  0xc0   : > { %v268_v6 = vand.u32 2147483647, %v930_v3  ;;  %v267_v7 = vand.u32 2147483647, %v932_v4  ;;  %v247_v60 = vmin.f32 %v930_v3, 0.0  ;;  %v246_v1 = vmin.f32 %v932_v4, 0.0 }
  0xc1   : > { %v172_v8 = vpop.xlane.xlu1 %171  ;;  %v936_v9 = vpop.xlane.xlu0 %162 }
  0xc2   : > { %v289_v10 = vsub.f32 0.0, %v268_v6  ;;  %v288_v5 = vsub.f32 0.0, %v267_v7  ;;  %v938_v11 = vmul.f32 -1.0, %v172_v8  ;;  %v266_v12 = vand.u32 2147483647, %v936_v9 }
  0xc4   : > { %v312_v13 = vmul.f32 1.442695, %v289_v10  ;;  %v310_v14 = vmul.f32 1.442695, %v288_v5  ;;  %v269_v15 = vand.u32 2147483647, %v938_v11 }
  0xc5   : > { %v287_v16 = vsub.f32 0.0, %v266_v12  ;;  %v178_v17 = vpop.xlane.xlu1 %177  ;;  %v175_v18 = vpop.xlane.xlu0 %174  ;;  %v245_v5 = vmin.f32 %v936_v9, 0.0 }
  0xc6   : > { %676 = vpow2.f32 %v312_v13  ;;  %v942_v19 = vmul.f32 -1.0, %v178_v17  ;;  %v944_v20 = vmul.f32 -1.0, %v175_v18  ;;  %v290_v21 = vsub.f32 0.0, %v269_v15 }
  0xc7   : > { %678 = vpow2.f32 %v310_v14  ;;  %v308_v22 = vmul.f32 1.442695, %v287_v16 }
  0xc8   : > { %v271_v23 = vand.u32 2147483647, %v942_v19  ;;  %v270_v24 = vand.u32 2147483647, %v944_v20  ;;  %v314_v25 = vmul.f32 1.442695, %v290_v21 }
  0xc9   : > { %680 = vpow2.f32 %v308_v22  ;;  %v184_v26 = vpop.xlane.xlu1 %183  ;;  %v181_v27 = vpop.xlane.xlu0 %180 }
  0xca   : > { %v292_v28 = vsub.f32 0.0, %v271_v23  ;;  %v291_v29 = vsub.f32 0.0, %v270_v24  ;;  %v948_v30 = vmul.f32 -1.0, %v184_v26  ;;  %682 = vpow2.f32 %v314_v25 }
  0xcb   : > { %v951_v34 = vmul.f32 -1.0, %v181_v27 }
  0xcc   : > { %v318_v31 = vmul.f32 1.442695, %v292_v28  ;;  %v316_v32 = vmul.f32 1.442695, %v291_v29  ;;  %v273_v33 = vand.u32 2147483647, %v948_v30 }
  0xcd   : > { %v190_v35 = vpop.xlane.xlu1 %189  ;;  %v187_v36 = vpop.xlane.xlu0 %186  ;;  %v272_v44 = vand.u32 2147483647, %v951_v34 }
  0xce   : > { %684 = vpow2.f32 %v318_v31  ;;  %v294_v37 = vsub.f32 0.0, %v273_v33  ;;  %v953_v38 = vmul.f32 -1.0, %v190_v35  ;;  %v955_v40 = vmul.f32 -1.0, %v187_v36 }
  0xcf   : > { %686 = vpow2.f32 %v316_v32  ;;  %v293_v51 = vsub.f32 0.0, %v272_v44 }
  0xd0   : > { %v677_v39 = vpop.eup %676  ;;  %v322_v43 = vmul.f32 1.442695, %v294_v37  ;;  %v275_v47 = vand.u32 2147483647, %v953_v38  ;;  %v274_v49 = vand.u32 2147483647, %v955_v40 }
  0xd1   : > { %v679_v41 = vpop.eup %678  ;;  %v368_v42 = vadd.f32 1.0, %v677_v39  ;;  %v371_v54 = vmul.f32 -0.5, %v677_v39  ;;  %v374_v57 = vand.u32 2147483647, %v677_v39  ;;  %v320_v63 = vmul.f32 1.442695, %v293_v51  ;;  %v196_v0 = vpop.xlane.xlu1 %195 }
  0xd2   : > { %v359_v45 = vadd.f32 1.0, %v679_v41  ;;  %v362_v52 = vmul.f32 -0.5, %v679_v41  ;;  %v296_v55 = vsub.f32 0.0, %v275_v47  ;;  %v295_v58 = vsub.f32 0.0, %v274_v49  ;;  %v193_v8 = vpop.xlane.xlu0 %192 }
  0xd3   : > { %v958_v46 = vpop.eup %680  ;;  %688 = vlog2.f32 %v368_v42  ;;  %v365_v61 = vand.u32 2147483647, %v679_v41  ;;  %v372_v10 = vadd.f32 1.0, %v371_v54  ;;  %v977_v15 = vmul.f32 -1.0, %v196_v0 }
  0xd4   : > { %690 = vlog2.f32 %v359_v45  ;;  %v350_v48 = vadd.f32 1.0, %v958_v46  ;;  %v963_v50 = vpop.eup %682  ;;  %v363_v2 = vadd.f32 1.0, %v362_v52  ;;  %v353_v6 = vmul.f32 -0.5, %v958_v46 }
  0xd5   : > { %692 = vpow2.f32 %v322_v43  ;;  %v377_v53 = vadd.f32 1.0, %v963_v50  ;;  %v326_v12 = vmul.f32 1.442695, %v296_v55  ;;  %v356_v13 = vand.u32 2147483647, %v958_v46 }
  0xd6   : > { %694 = vlog2.f32 %v350_v48  ;;  %v324_v14 = vmul.f32 1.442695, %v295_v58  ;;  %vm979_vm3 = vcmp.lt.f32.partialorder %v374_v57, 0.0004427343  ;;  %vm983_vm4 = vcmp.lt.f32.partialorder %v365_v61, 0.0004427343  ;;  %v202_v57 = vpop.xlane.xlu1 %201 }
  0xd7   : > { %696 = vlog2.f32 %v377_v53  ;;  %v987_v9 = vmul.f32 -1.0, %v193_v8  ;;  %v364_v21 = vmul.f32 %v679_v41, %v363_v2  ;;  %v380_v22 = vmul.f32 -0.5, %v963_v50 }
  0xd8   : > { %v966_v56 = vpop.eup %684  ;;  %v383_v23 = vand.u32 2147483647, %v963_v50  ;;  %v354_v24 = vadd.f32 1.0, %v353_v6  ;;  %v277_v28 = vand.u32 2147483647, %v977_v15  ;;  %v373_v31 = vmul.f32 %v677_v39, %v372_v10 }
  0xd9   : > { %v968_v59 = vpop.eup %686  ;;  %v395_v62 = vadd.f32 1.0, %v966_v56  ;;  %vm995_vm5 = vcmp.lt.f32.partialorder %v356_v13, 0.0004427343  ;;  %v276_v41 = vand.u32 2147483647, %v987_v9  ;;  %v381_v43 = vadd.f32 1.0, %v380_v22 }
  0xda   : > { %v386_v7 = vadd.f32 1.0, %v968_v59  ;;  %v389_v27 = vmul.f32 -0.5, %v968_v59  ;;  %v298_v37 = vsub.f32 0.0, %v277_v28  ;;  %v355_v45 = vmul.f32 %v958_v46, %v354_v24 }
  0xdb   : > { %698 = vlog2.f32 %v395_v62  ;;  %v398_v39 = vmul.f32 -0.5, %v966_v56  ;;  %vm1005_vm6 = vcmp.lt.f32.partialorder %v383_v23, 0.0004427343  ;;  %v401_v48 = vand.u32 2147483647, %v966_v56 }
  0xdc   : > { %700 = vlog2.f32 %v386_v7  ;;  %v390_v49 = vadd.f32 1.0, %v389_v27  ;;  %v297_v51 = vsub.f32 0.0, %v276_v41  ;;  %v330_v55 = vmul.f32 1.442695, %v298_v37  ;;  %v208_v41 = vpop.xlane.xlu1 %207 }
  0xdd   : > { %v689_v16 = vpop.eup %688  ;;  %702 = vpow2.f32 %v320_v63  ;;  %v382_v0 = vmul.f32 %v963_v50, %v381_v43  ;;  %v399_v2 = vadd.f32 1.0, %v398_v39  ;;  %v392_v6 = vand.u32 2147483647, %v968_v59 }
  0xde   : > { %v691_v18 = vpop.eup %690  ;;  %704 = vpow2.f32 %v326_v12  ;;  %v370_v29 = vmul.f32 0.6931472, %v689_v16  ;;  %v328_v62 = vmul.f32 1.442695, %v297_v51  ;;  %v1019_v10 = vmul.f32 -1.0, %v202_v57 }
  0xdf   : > { %v991_v25 = vpop.eup %692  ;;  %v361_v26 = vmul.f32 0.6931472, %v691_v18  ;;  %706 = vpow2.f32 %v324_v14  ;;  %v391_v17 = vmul.f32 %v968_v59, %v390_v49  ;;  %v199_v18 = vpop.xlane.xlu0 %198  ;;  %v248_v22 = vmin.f32 %v938_v11, 0.0 }
  0xe0   : > { %v695_v33 = vpop.eup %694  ;;  %v413_v36 = vadd.f32 1.0, %v991_v25  ;;  %v376_v52 = vsel %vm979_vm3, %v373_v31, %v370_v29  ;;  %v400_v3 = vmul.f32 %v966_v56, %v399_v2  ;;  %vm393_vm7 = vcmp.lt.f32.partialorder %v392_v6, 0.0004427343 }
  0xe1   : > { %v367_v35 = vsel %vm983_vm4, %v364_v21, %v361_v26  ;;  %v697_v42 = vpop.eup %696  ;;  %v352_v44 = vmul.f32 0.6931472, %v695_v33  ;;  %vm1034_vm8 = vcmp.lt.f32.partialorder %v401_v48, 0.0004427343  ;;  %v416_v24 = vmul.f32 -0.5, %v991_v25 }
  0xe2   : > { %v540_v53 = vsub.f32 %v246_v1, %v367_v35  ;;  %v379_v58 = vmul.f32 0.6931472, %v697_v42  ;;  %708 = vlog2.f32 %v413_v36  ;;  %v279_v26 = vand.u32 2147483647, %v1019_v10 }
  0xe3   : > { %v358_v54 = vsel %vm995_vm5, %v355_v45, %v352_v44  ;;  %710 = vpow2.f32 %v330_v55  ;;  %v249_v11 = vmin.f32 %v944_v20, 0.0  ;;  %v250_v29 = vmin.f32 %v942_v19, 0.0  ;;  %v205_v45 = vpop.xlane.xlu0 %204 }
  0xe4   : > { %v539_v61 = vsub.f32 %v245_v5, %v358_v54  ;;  %712 = vpow2.f32 %v328_v62  ;;  %v541_v5 = vsub.f32 %v247_v60, %v376_v52  ;;  %v562_v12 = vsel %vm560_vm2, %v540_v53, 0.0 }
  0xe5   : > { %v699_v46 = vpop.eup %698  ;;  %v385_v16 = vsel %vm1005_vm6, %v382_v0, %v379_v58  ;;  %v252_v35 = vmin.f32 %v948_v30, 0.0  ;;  %v419_v36 = vand.u32 2147483647, %v991_v25  ;;  %v417_v44 = vadd.f32 1.0, %v416_v24 }
  0xe6   : > { %v701_v63 = vpop.eup %700  ;;  %v561_v1 = vsel %vm560_vm2, %v539_v61, 0.0  ;;  %v397_v13 = vmul.f32 0.6931472, %v699_v46  ;;  %v564_v59 = vsel %vm560_vm2, %v541_v5, 0.0  ;;  %v542_v27 = vsub.f32 %v248_v22, %v385_v16 }
  0xe7   : > { %v1016_v7 = vpop.eup %702  ;;  %v388_v8 = vmul.f32 0.6931472, %v701_v63  ;;  %v563_v4 = vadd.f32 %v562_v12, %v561_v1  ;;  %v300_v20 = vsub.f32 0.0, %v279_v26  ;;  %v251_v47 = vmin.f32 %v951_v34, 0.0 }
  0xe8   : > { %v404_v50 = vadd.f32 1.0, %v1016_v7  ;;  %v1025_v14 = vpop.eup %704  ;;  %v403_v28 = vsel %vm1034_vm8, %v400_v3, %v397_v13  ;;  %v407_v31 = vmul.f32 -0.5, %v1016_v7  ;;  %v566_v19 = vsel %vm560_vm2, %v542_v27, 0.0 }
  0xe9   : > { %v1030_v21 = vpop.eup %706  ;;  %v394_v23 = vsel %vm393_vm7, %v391_v17, %v388_v8  ;;  %v565_v56 = vadd.f32 %v564_v59, %v563_v4  ;;  %v431_v37 = vadd.f32 1.0, %v1025_v14  ;;  %v544_v43 = vsub.f32 %v250_v29, %v403_v28  ;;  %v214_v8 = vpop.xlane.xlu1 %213 }
  0xea   : > { %714 = vlog2.f32 %v404_v50  ;;  %v422_v32 = vadd.f32 1.0, %v1030_v21  ;;  %v543_v33 = vsub.f32 %v249_v11, %v394_v23  ;;  %v410_v48 = vand.u32 2147483647, %v1016_v7 }
  0xeb   : > { %v1055_v49 = vmul.f32 -1.0, %v199_v18  ;;  %v567_v52 = vadd.f32 %v566_v19, %v565_v56  ;;  %v408_v53 = vadd.f32 1.0, %v407_v31  ;;  %v254_v54 = vmin.f32 %v953_v38, 0.0 }
  0xec   : > { %v709_v42 = vpop.eup %708  ;;  %716 = vlog2.f32 %v422_v32  ;;  %v334_v55 = vmul.f32 1.442695, %v300_v20  ;;  %v568_v57 = vsel %vm560_vm2, %v543_v33, 0.0  ;;  %vm1061_vm9 = vcmp.lt.f32.partialorder %v419_v36, 0.0004427343 }
  0xed   : > { %v1050_v39 = vpop.eup %710  ;;  %718 = vlog2.f32 %v431_v37  ;;  %v570_v58 = vsel %vm560_vm2, %v544_v43, 0.0  ;;  %v418_v61 = vmul.f32 %v991_v25, %v417_v44  ;;  %v425_v62 = vmul.f32 -0.5, %v1030_v21  ;;  %v211_v25 = vpop.xlane.xlu0 %210 }
  0xee   : > { %v1057_v51 = vpop.eup %712  ;;  %v449_v63 = vadd.f32 1.0, %v1050_v39  ;;  %v415_v2 = vmul.f32 0.6931472, %v709_v42  ;;  %vm1070_vm10 = vcmp.lt.f32.partialorder %v410_v48, 0.0004427343  ;;  %v569_v5 = vadd.f32 %v568_v57, %v567_v52  ;;  %v220_v48 = vpop.xlane.xlu1 %219 }
  0xef   : > { %v440_v34 = vadd.f32 1.0, %v1057_v51  ;;  %v278_v1 = vand.u32 2147483647, %v1055_v49  ;;  %v409_v13 = vmul.f32 %v1016_v7, %v408_v53  ;;  %v428_v50 = vand.u32 2147483647, %v1030_v21 }
  0xf0   : > { %v1077_v4 = vmul.f32 -1.0, %v208_v41  ;;  %v1079_v17 = vmul.f32 -1.0, %v205_v45  ;;  %v426_v22 = vadd.f32 1.0, %v425_v62  ;;  %v1083_v3 = vmul.f32 -1.0, %v214_v8 }
  0xf1   : > { %720 = vlog2.f32 %v440_v34  ;;  %v299_v16 = vsub.f32 0.0, %v278_v1  ;;  %v1086_v24 = vmul.f32 -1.0, %v211_v25  ;;  %v421_v59 = vsel %vm1061_vm9, %v418_v61, %v415_v2  ;;  %v217_v62 = vpop.xlane.xlu0 %216 }
  0xf2   : > { %722 = vpow2.f32 %v334_v55  ;;  %v281_v7 = vand.u32 2147483647, %v1077_v4  ;;  %v434_v27 = vmul.f32 -0.5, %v1025_v14  ;;  %v437_v28 = vand.u32 2147483647, %v1025_v14 }
  0xf3   : > { %724 = vlog2.f32 %v449_v63  ;;  %v332_v23 = vmul.f32 1.442695, %v299_v16  ;;  %v280_v11 = vand.u32 2147483647, %v1079_v17  ;;  %v571_v56 = vadd.f32 %v570_v58, %v569_v5 }
  0xf4   : > { %v715_v0 = vpop.eup %714  ;;  %v443_v31 = vmul.f32 -0.5, %v1057_v51  ;;  %v427_v32 = vmul.f32 %v1030_v21, %v426_v22  ;;  %v302_v33 = vsub.f32 0.0, %v281_v7  ;;  %v283_v37 = vand.u32 2147483647, %v1083_v3 }
  0xf5   : > { %v406_v12 = vmul.f32 0.6931472, %v715_v0  ;;  %726 = vpow2.f32 %v332_v23  ;;  %v301_v36 = vsub.f32 0.0, %v280_v11  ;;  %v253_v43 = vmin.f32 %v955_v40, 0.0 }
  0xf6   : > { %v717_v26 = vpop.eup %716  ;;  %vm1098_vm11 = vcmp.lt.f32.partialorder %v428_v50, 0.0004427343  ;;  %v282_v20 = vand.u32 2147483647, %v1086_v24  ;;  %v435_v45 = vadd.f32 1.0, %v434_v27  ;;  %v546_v53 = vsub.f32 %v252_v35, %v421_v59 }
  0xf7   : > { %v412_v18 = vsel %vm1070_vm10, %v409_v13, %v406_v12  ;;  %v424_v29 = vmul.f32 0.6931472, %v717_v26  ;;  %v719_v41 = vpop.eup %718  ;;  %v338_v21 = vmul.f32 1.442695, %v302_v33  ;;  %vm1107_vm12 = vcmp.lt.f32.partialorder %v437_v28, 0.0004427343  ;;  %v223_v28 = vpop.xlane.xlu0 %222 }
  0xf8   : > { %v545_v60 = vsub.f32 %v251_v47, %v412_v18  ;;  %v336_v47 = vmul.f32 1.442695, %v301_v36  ;;  %v452_v40 = vmul.f32 -0.5, %v1050_v39  ;;  %v444_v57 = vadd.f32 1.0, %v443_v31 }
  0xf9   : > { %v430_v19 = vsel %vm1098_vm11, %v427_v32, %v424_v29  ;;  %v433_v58 = vmul.f32 0.6931472, %v719_v41  ;;  %728 = vpow2.f32 %v338_v21  ;;  %v304_v61 = vsub.f32 0.0, %v283_v37 }
  0xfa   : > { %v572_v42 = vsel %vm560_vm2, %v545_v60, 0.0  ;;  %v547_v63 = vsub.f32 %v253_v43, %v430_v19  ;;  %v303_v2 = vsub.f32 0.0, %v282_v20  ;;  %v1115_v30 = vmul.f32 -1.0, %v220_v48 }
  0xfb   : > { %v721_v52 = vpop.eup %720  ;;  %v573_v34 = vadd.f32 %v572_v42, %v571_v56  ;;  %v436_v6 = vmul.f32 %v1025_v14, %v435_v45  ;;  %v455_v1 = vand.u32 2147483647, %v1050_v39  ;;  %v446_v8 = vand.u32 2147483647, %v1057_v51 }
  0xfc   : > { %v1112_v46 = vpop.eup %722  ;;  %730 = vpow2.f32 %v336_v47  ;;  %v574_v5 = vsel %vm560_vm2, %v546_v53, 0.0  ;;  %v442_v12 = vmul.f32 0.6931472, %v721_v52  ;;  %v1121_v13 = vmul.f32 -1.0, %v217_v62 }
  0xfd   : > { %v467_v0 = vadd.f32 1.0, %v1112_v46  ;;  %v725_v35 = vpop.eup %724  ;;  %v575_v25 = vadd.f32 %v574_v5, %v573_v34  ;;  %v453_v50 = vadd.f32 1.0, %v452_v40  ;;  %v445_v16 = vmul.f32 %v1057_v51, %v444_v57 }
  0xfe   : > { %v342_v18 = vmul.f32 1.442695, %v304_v61  ;;  %v439_v14 = vsel %vm1107_vm12, %v436_v6, %v433_v58  ;;  %v576_v60 = vsel %vm560_vm2, %v547_v63, 0.0  ;;  %v340_v23 = vmul.f32 1.442695, %v303_v2 }
  0xff   : > { %732 = vlog2.f32 %v467_v0  ;;  %v1124_v22 = vpop.eup %726  ;;  %v285_v7 = vand.u32 2147483647, %v1115_v30  ;;  %v451_v26 = vmul.f32 0.6931472, %v725_v35  ;;  %v255_v59 = vmin.f32 %v987_v9, 0.0 }
 0x100   : > { %vm1131_vm13 = vcmp.lt.f32.partialorder %v446_v8, 0.0004427343  ;;  %v458_v51 = vadd.f32 1.0, %v1124_v22  ;;  %734 = vpow2.f32 %v342_v18  ;;  %v284_v29 = vand.u32 2147483647, %v1121_v13 }
 0x101   : > { %v448_v11 = vsel %vm1131_vm13, %v445_v16, %v442_v12  ;;  %v306_v56 = vsub.f32 0.0, %v285_v7  ;;  %v548_v31 = vsub.f32 %v254_v54, %v439_v14  ;;  %v577_v32 = vadd.f32 %v576_v60, %v575_v25 }
 0x102   : > { %v454_v9 = vmul.f32 %v1050_v39, %v453_v50  ;;  %736 = vlog2.f32 %v458_v51  ;;  %v305_v36 = vsub.f32 0.0, %v284_v29  ;;  %v1142_v37 = vmul.f32 -1.0, %v223_v28 }
 0x103   : > { %738 = vpow2.f32 %v340_v23  ;;  %v346_v33 = vmul.f32 1.442695, %v306_v56  ;;  %v1144_v41 = vpop.eup %728  ;;  %vm1146_vm14 = vcmp.lt.f32.partialorder %v455_v1, 0.0004427343  ;;  %v549_v43 = vsub.f32 %v255_v59, %v448_v11 }
 0x104   : > { %v470_v44 = vmul.f32 -0.5, %v1112_v46  ;;  %v457_v38 = vsel %vm1146_vm14, %v454_v9, %v451_v26  ;;  %v461_v39 = vmul.f32 -0.5, %v1124_v22  ;;  %v485_v54 = vadd.f32 1.0, %v1144_v41 }
 0x105   : > { %740 = vpow2.f32 %v346_v33  ;;  %v578_v45 = vsel %vm560_vm2, %v548_v31, 0.0  ;;  %v256_v19 = vmin.f32 %v977_v15, 0.0  ;;  %v344_v21 = vmul.f32 1.442695, %v305_v36 }
 0x106   : > { %v1155_v20 = vpop.eup %730  ;;  %v286_v47 = vand.u32 2147483647, %v1142_v37  ;;  %v579_v52 = vadd.f32 %v578_v45, %v577_v32  ;;  %742 = vlog2.f32 %v485_v54  ;;  %v580_v40 = vsel %vm560_vm2, %v549_v43, 0.0 }
 0x107   : > { %v476_v53 = vadd.f32 1.0, %v1155_v20  ;;  %v550_v55 = vsub.f32 %v256_v19, %v457_v38  ;;  %v471_v57 = vadd.f32 1.0, %v470_v44  ;;  %744 = vpow2.f32 %v344_v21 }
 0x108   : > { %v473_v34 = vand.u32 2147483647, %v1112_v46  ;;  %v462_v58 = vadd.f32 1.0, %v461_v39  ;;  %v307_v61 = vsub.f32 0.0, %v286_v47  ;;  %v258_v15 = vmin.f32 %v1019_v10, 0.0 }
 0x109   : > { %v733_v48 = vpop.eup %732  ;;  %746 = vlog2.f32 %v476_v53  ;;  %v464_v63 = vand.u32 2147483647, %v1124_v22  ;;  %v581_v2 = vadd.f32 %v580_v40, %v579_v52  ;;  %v257_v35 = vmin.f32 %v1055_v49, 0.0 }
 0x10a   : > { %v469_v62 = vmul.f32 0.6931472, %v733_v48  ;;  %v1165_v0 = vpop.eup %734  ;;  %v488_v6 = vmul.f32 -0.5, %v1144_v41  ;;  %v348_v1 = vmul.f32 1.442695, %v307_v61  ;;  %v582_v5 = vsel %vm560_vm2, %v550_v55, 0.0 }
 0x10b   : > { %v472_v12 = vmul.f32 %v1112_v46, %v471_v57  ;;  %v479_v25 = vmul.f32 -0.5, %v1155_v20  ;;  %v503_v10 = vadd.f32 1.0, %v1165_v0  ;;  %vm1175_vm15 = vcmp.lt.f32.partialorder %v473_v34, 0.0004427343 }
 0x10c   : > { %v737_v8 = vpop.eup %736  ;;  %v463_v49 = vmul.f32 %v1124_v22, %v462_v58  ;;  %748 = vpow2.f32 %v348_v1  ;;  %vm465_vm0 = vcmp.lt.f32.partialorder %v464_v63, 0.0004427343  ;;  %v583_v23 = vadd.f32 %v582_v5, %v581_v2 }
 0x10d   : > { %v1173_v50 = vpop.eup %738  ;;  %v460_v18 = vmul.f32 0.6931472, %v737_v8  ;;  %v475_v14 = vsel %vm1175_vm15, %v472_v12, %v469_v62  ;;  %750 = vlog2.f32 %v503_v10  ;;  %v489_v26 = vadd.f32 1.0, %v488_v6 }
 0x10e   : > { %v494_v46 = vadd.f32 1.0, %v1173_v50  ;;  %v491_v59 = vand.u32 2147483647, %v1144_v41  ;;  %v480_v51 = vadd.f32 1.0, %v479_v25  ;;  %v552_v11 = vsub.f32 %v258_v15, %v475_v14 }
 0x10f   : > { %v1183_v60 = vpop.eup %740  ;;  %v466_v7 = vsel %vm465_vm0, %v463_v49, %v460_v18  ;;  %v482_v56 = vand.u32 2147483647, %v1155_v20  ;;  %v506_v29 = vmul.f32 -0.5, %v1165_v0  ;;  %v260_v9 = vmin.f32 %v1077_v4, 0.0 }
 0x110   : > { %v551_v27 = vsub.f32 %v257_v35, %v466_v7  ;;  %752 = vlog2.f32 %v494_v46  ;;  %v521_v22 = vadd.f32 1.0, %v1183_v60  ;;  %v743_v28 = vpop.eup %742  ;;  %v490_v43 = vmul.f32 %v1144_v41, %v489_v26 }
 0x111   : > { %v1189_v31 = vpop.eup %744  ;;  %v487_v33 = vmul.f32 0.6931472, %v743_v28  ;;  %v259_v44 = vmin.f32 %v1079_v17, 0.0  ;;  %v497_v38 = vmul.f32 -0.5, %v1173_v50  ;;  %vm1196_vm1 = vcmp.lt.f32.partialorder %v491_v59, 0.0004427343 }
 0x112   : > { %v584_v32 = vsel %vm560_vm2, %v551_v27, 0.0  ;;  %754 = vlog2.f32 %v521_v22  ;;  %v481_v45 = vmul.f32 %v1155_v20, %v480_v51  ;;  %v512_v19 = vadd.f32 1.0, %v1189_v31 }
 0x113   : > { %v747_v36 = vpop.eup %746  ;;  %v585_v42 = vadd.f32 %v584_v32, %v583_v23  ;;  %v586_v4 = vsel %vm560_vm2, %v552_v11, 0.0  ;;  %v493_v21 = vsel %vm1196_vm1, %v490_v43, %v487_v33  ;;  %vm483_vm3 = vcmp.lt.f32.partialorder %v482_v56, 0.0004427343 }
 0x114   : > { %v478_v54 = vmul.f32 0.6931472, %v747_v36  ;;  %v507_v41 = vadd.f32 1.0, %v506_v29  ;;  %v509_v48 = vand.u32 2147483647, %v1165_v0  ;;  %756 = vlog2.f32 %v512_v19 }
 0x115   : > { %v587_v47 = vadd.f32 %v586_v4, %v585_v42  ;;  %v498_v55 = vadd.f32 1.0, %v497_v38  ;;  %v524_v40 = vmul.f32 -0.5, %v1183_v60  ;;  %v554_v57 = vsub.f32 %v260_v9, %v493_v21 }
 0x116   : > { %v484_v17 = vsel %vm483_vm3, %v481_v45, %v478_v54  ;;  %v749_v52 = vpop.eup %748  ;;  %v500_v34 = vand.u32 2147483647, %v1173_v50  ;;  %v515_v58 = vmul.f32 -0.5, %v1189_v31  ;;  %v262_v62 = vmin.f32 %v1083_v3, 0.0 }
 0x117   : > { %v553_v53 = vsub.f32 %v259_v44, %v484_v17  ;;  %v751_v20 = vpop.eup %750  ;;  %v530_v61 = vadd.f32 1.0, %v749_v52  ;;  %v508_v2 = vmul.f32 %v1165_v0, %v507_v41  ;;  %vm1212_vm4 = vcmp.lt.f32.partialorder %v509_v48, 0.0004427343 }
 0x118   : > { %v505_v63 = vmul.f32 0.6931472, %v751_v20  ;;  %v261_v8 = vmin.f32 %v1086_v24, 0.0  ;;  %v499_v25 = vmul.f32 %v1173_v50, %v498_v55  ;;  %v525_v10 = vadd.f32 1.0, %v524_v40 }
 0x119   : > { %v588_v15 = vsel %vm560_vm2, %v553_v53, 0.0  ;;  %758 = vlog2.f32 %v530_v61  ;;  %v590_v16 = vsel %vm560_vm2, %v554_v57, 0.0  ;;  %vm501_vm5 = vcmp.lt.f32.partialorder %v500_v34, 0.0004427343 }
 0x11a   : > { %v753_v35 = vpop.eup %752  ;;  %v589_v6 = vadd.f32 %v588_v15, %v587_v47  ;;  %v511_v5 = vsel %vm1212_vm4, %v508_v2, %v505_v63  ;;  %v527_v0 = vand.u32 2147483647, %v1183_v60  ;;  %v516_v18 = vadd.f32 1.0, %v515_v58 }
 0x11b   : > { %v496_v12 = vmul.f32 0.6931472, %v753_v35  ;;  %v533_v23 = vmul.f32 -0.5, %v749_v52  ;;  %v556_v24 = vsub.f32 %v262_v62, %v511_v5  ;;  %v518_v26 = vand.u32 2147483647, %v1189_v31 }
 0x11c   : > { %v755_v3 = vpop.eup %754  ;;  %v591_v49 = vadd.f32 %v590_v16, %v589_v6  ;;  %v526_v59 = vmul.f32 %v1183_v60, %v525_v10  ;;  %v264_v51 = vmin.f32 %v1115_v30, 0.0  ;;  %vm528_vm6 = vcmp.lt.f32.partialorder %v527_v0, 0.0004427343 }
 0x11d   : > { %v502_v14 = vsel %vm501_vm5, %v499_v25, %v496_v12  ;;  %v523_v46 = vmul.f32 0.6931472, %v755_v3  ;;  %v517_v22 = vmul.f32 %v1189_v31, %v516_v18  ;;  %v534_v29 = vadd.f32 1.0, %v533_v23 }
 0x11e   : > { %v555_v7 = vsub.f32 %v261_v8, %v502_v14  ;;  %v757_v27 = vpop.eup %756  ;;  %v594_v32 = vsel %vm560_vm2, %v556_v24, 0.0  ;;  %v263_v9 = vmin.f32 %v1121_v13, 0.0  ;;  %vm519_vm7 = vcmp.lt.f32.partialorder %v518_v26, 0.0004427343 }
 0x11f   : > { %v529_v11 = vsel %vm528_vm6, %v526_v59, %v523_v46  ;;  %v514_v56 = vmul.f32 0.6931472, %v757_v27  ;;  %v536_v33 = vand.u32 2147483647, %v749_v52  ;;  %v535_v30 = vmul.f32 %v749_v52, %v534_v29 }
 0x120   : > { %v592_v50 = vsel %vm560_vm2, %v555_v7, 0.0  ;;  %v558_v43 = vsub.f32 %v264_v51, %v529_v11  ;;  %v265_v39 = vmin.f32 %v1142_v37, 0.0 }
 0x121   : > { %v593_v28 = vadd.f32 %v592_v50, %v591_v49  ;;  %v520_v36 = vsel %vm519_vm7, %v517_v22, %v514_v56  ;;  %vm537_vm8 = vcmp.lt.f32.partialorder %v536_v33, 0.0004427343 }
 0x122   : > { %v557_v44 = vsub.f32 %v263_v9, %v520_v36  ;;  %v598_v13 = vsel %vm560_vm2, %v558_v43, 0.0 }
 0x123   : > { %v595_v60 = vadd.f32 %v594_v32, %v593_v28  ;;  %v759_v42 = vpop.eup %758 }
 0x124   : > { %v532_v38 = vmul.f32 0.6931472, %v759_v42  ;;  %v596_v31 = vsel %vm560_vm2, %v557_v44, 0.0 }
 0x125   : > { %v597_v45 = vadd.f32 %v596_v31, %v595_v60 }
 0x126   : > { %v538_v54 = vsel %vm537_vm8, %v535_v30, %v532_v38 }
 0x127   : > { %v559_v19 = vsub.f32 %v265_v39, %v538_v54  ;;  %v599_v4 = vadd.f32 %v598_v13, %v597_v45 }
 0x129   : > { %v600_v21 = vsel %vm560_vm2, %v559_v19, 0.0 }
 0x12a   : > { %v601_v41 = vadd.f32 %v600_v21, %v599_v4 }
 0x12c   : > { %602 = vadd.xlane.f32.xlu1 %v601_v41 }
 0x1b9   : > { %v603_v47 = vpop.xlane.xlu1 %602 }
 0x1ba   : > { %v604_v17 = vrot.slane %v603_v47, 4 }
 0x1bc   : > { %v605_v48 = vadd.f32 %v604_v17, %v603_v47 }
 0x1be   : > { %v606_v52 = vrot.slane %v605_v48, 2 }
 0x1c0   : > { %v607_v53 = vadd.f32 %v606_v52, %v605_v48 }
 0x1c2   : > { %v608_v37 = vrot.slane %v607_v53, 1 }
 0x1c4   : > { %v609_v55 = vadd.f32 %v608_v37, %v607_v53 }
 0x1c6   : > { %647 = vpush %v609_v55 }
 0x1f4   :  { %93 = sbr.rel (!%p91_p11) target bundleno = 26 (0x1a), region = 56 }
 0x1f7   : > { %s648_s12 = spop %647 }
 0x1f8   : > { %s611_s13 = sadd.f32 %s824_s1, %s648_s12  }
 0x1fa   : > { %s1284_s1 = smov %s611_s13  ;;  %s612_s14 = smul.f32 (%p91_p11), 0.125, %s611_s13 }
 0x1fc   :  { %v613_v40 = vstv %s612_s14 }
 0x1fd   :  { %615 = vst [vmem:[#allocation6] sm:$0xff] %v613_v40 }
 0x1fe   :  { %795 = shalt.err (!%p792_p2)
}
 0x1ff   :  { %s796_s20 = scalar_lea.hbm %s1254_s4, 128 }
 0x200   :  { %p797_p3 = scmp.ne.s32.totalorder %s1254_s4, %s796_s20  ;;  %p800_p4 = scmp.lt.u32.totalorder %s796_s20, %s1254_s4 }
 0x202   :  { %p802_p5 = pnand %p800_p4, %p797_p3 }
 0x204   :  { %805 = shalt.err (!%p802_p5)
}
 0x205   :  { %625 = dma.vmem_to_hbm [thread:$0]  %s623_s16, 128, %s1254_s4, [#allocation7]  }
 0x206   :  { %820 = dma.done.wait [#allocation7], 128  }
 0x207   :  { %821 = vsyncadd [#allocation7], 4294967168 }
 0x208   :  { %629 = vsyncpa [#allocation7], 1 }

</bundles_post_ra>
